<compile_context>
chip_gen: v7x
topology: tpu7x:2x2x1
jax: 0.10.0
libtpu: 0.0.40
codegen_flags: <defaults>
</compile_context>

<pallas_src>
import jax
import jax.numpy as jnp
from jax.experimental import pallas as pl
from jax.experimental.pallas import tpu as pltpu

_LANE_WIDTH = 128
_TARGET_BLOCK_BYTES = 2 << 20  # ~2 MiB per x block; 4 double-buffered bufs ~ 8 MiB


def scale_shift_kernel(x_ref, p_ref, o_ref):
    # x_ref: (tile_rows, W); p_ref: (2, W) with row 0 = scale, row 1 = shift.
    scale = p_ref[pl.ds(0, 1), :]  # (1, W)
    shift = p_ref[pl.ds(1, 1), :]  # (1, W)
    o_ref[...] = x_ref[...] * scale + shift


def _scale_shift_2d(x2, params):
    """x2: (rows, W); params: (2, W). Returns x2 * params[0] + params[1]."""
    rows, width = x2.shape
    itemsize = jnp.dtype(x2.dtype).itemsize

    # Pick a row tile that is a multiple of 8 and ~_TARGET_BLOCK_BYTES; fall back to the
    # whole array when it is small (block_shape == full dims is always legal).
    tb = max(8, (_TARGET_BLOCK_BYTES // (width * itemsize)) // 8 * 8)
    if tb >= rows:
        tb = rows
        grid = (1,)
    else:
        grid = (pl.cdiv(rows, tb),)

    return pl.pallas_call(
        scale_shift_kernel,
        out_shape=jax.ShapeDtypeStruct((rows, width), x2.dtype),
        grid_spec=pltpu.PrefetchScalarGridSpec(
            num_scalar_prefetch=0,
            grid=grid,
            in_specs=[
                pl.BlockSpec((tb, width), lambda i: (i, 0)),   # x: tiled over rows
                pl.BlockSpec((2, width), lambda i: (0, 0)),    # params: pinned
            ],
            out_specs=pl.BlockSpec((tb, width), lambda i: (i, 0)),
        ),
        compiler_params=pltpu.CompilerParams(
            dimension_semantics=("parallel",),  # shards rows across TCs on v7x
        ),
    )(x2, params)


def scale_shift(x, scale, shift):
    """Applies y = x * scale + shift with broadcasting over the leading axis.

    x:     (B, size) float32
    scale: (size,)   float32
    shift: (size,)   float32
    """
    B, size = x.shape

    if _LANE_WIDTH % size == 0 and B % (_LANE_WIDTH // size) == 0:
        # Lane-dense path: fold `fold` batch rows into the 128-wide lane axis.
        fold = _LANE_WIDTH // size
        rows = B // fold
        x2 = x.reshape(rows, _LANE_WIDTH)
        params = jnp.stack(
            [jnp.tile(scale, fold), jnp.tile(shift, fold)], axis=0
        )  # (2, 128): per-feature broadcast preserved since lane j maps to feature j % size
        y2 = _scale_shift_2d(x2, params)
        return y2.reshape(B, size)

    # Fallback: keep the (B, size) layout (last dim == full array dim, so legal but
    # not lane-dense).
    params = jnp.stack([scale, shift], axis=0)  # (2, size)
    return _scale_shift_2d(x, params)


if __name__ == "__main__":
    # Module params: ScaleShift(size=32, scale=2.0, shift=-1.0)
    size = 32
    scale_val = 2.0
    shift_val = -1.0

    # nn.Parameter(torch.ones(size) * scale) / nn.Parameter(torch.ones(size) * shift)
    scale = jnp.ones((size,), dtype=jnp.float32) * scale_val
    shift = jnp.ones((size,), dtype=jnp.float32) * shift_val

    # Deterministic input
    key = jax.random.PRNGKey(0)
    x = jax.random.normal(key, (8, size), dtype=jnp.float32)

    y = jax.block_until_ready(scale_shift(x, scale, shift))

    # Reference check (plain JAX mirrors the PyTorch forward exactly)
    y_ref = x * scale + shift
    assert jnp.allclose(y, y_ref, atol=1e-6, rtol=1e-6), "mismatch vs reference"

    print("KERNEL_OK")
</pallas_src>

<mosaic_0001>
module attributes {stable_mosaic.version = 11 : i64} {
  func.func @scale_shift_kernel(%arg0: i32, %arg1: memref<2x128xf32, #tpu.memory_space<vmem>>, %arg2: memref<2x128xf32, #tpu.memory_space<vmem>>, %arg3: memref<2x128xf32, #tpu.memory_space<vmem>>) attributes {dimension_semantics = [#tpu.dimension_semantics<parallel>], iteration_bounds = array<i64: 1>, scalar_prefetch = 0 : i64, scratch_operands = 0 : i64, tpu.core_type = #tpu.core_type<tc>, window_params = [{transform_indices = @transform_0, window_bounds = array<i64: 2, 128>}, {pipeline_mode = #tpu.pipeline_mode<synchronous>, transform_indices = @transform_1, window_bounds = array<i64: 2, 128>}, {transform_indices = @transform_2, window_bounds = array<i64: 2, 128>}]} {
    %c0 = arith.constant 0 : index
    %c0_0 = arith.constant 0 : index
    %0 = vector.load %arg2[%c0, %c0_0] : memref<2x128xf32, #tpu.memory_space<vmem>>, vector<1x128xf32>
    %c1 = arith.constant 1 : index
    %c0_1 = arith.constant 0 : index
    %1 = vector.load %arg2[%c1, %c0_1] : memref<2x128xf32, #tpu.memory_space<vmem>>, vector<1x128xf32>
    %c0_2 = arith.constant 0 : index
    %c0_3 = arith.constant 0 : index
    %2 = vector.load %arg1[%c0_2, %c0_3] : memref<2x128xf32, #tpu.memory_space<vmem>>, vector<2x128xf32>
    %3 = vector.broadcast %0 : vector<1x128xf32> to vector<2x128xf32>
    %4 = arith.mulf %2, %3 : vector<2x128xf32>
    %5 = vector.broadcast %1 : vector<1x128xf32> to vector<2x128xf32>
    %6 = arith.addf %4, %5 : vector<2x128xf32>
    %c0_4 = arith.constant 0 : index
    %c0_5 = arith.constant 0 : index
    %7 = vector.load %arg3[%c0_4, %c0_5] : memref<2x128xf32, #tpu.memory_space<vmem>>, vector<2x128xf32>
    tpu.vector_store %arg3[%c0_4, %c0_5], %6 {strides = array<i32>} : memref<2x128xf32, #tpu.memory_space<vmem>>, vector<2x128xf32>,
    return
  }
  func.func @transform_0(%arg0: i32) -> (i32, i32) {
    %c0_i32 = arith.constant 0 : i32
    %c0_i32_0 = arith.constant 0 : i32
    return %arg0, %c0_i32 : i32, i32
  }
  func.func @transform_1(%arg0: i32) -> (i32, i32) {
    %c0_i32 = arith.constant 0 : i32
    %c0_i32_0 = arith.constant 0 : i32
    %c0_i32_1 = arith.constant 0 : i32
    return %c0_i32, %c0_i32_0 : i32, i32
  }
  func.func @transform_2(%arg0: i32) -> (i32, i32) {
    %c0_i32 = arith.constant 0 : i32
    %c0_i32_0 = arith.constant 0 : i32
    return %arg0, %c0_i32 : i32, i32
  }
}

</mosaic_0001>

<bundles_post_ra>
// kernel: tpu_custom_call.1
= control target key start
LH: loop header
LB: loop body
LE: loop exit
PB: predicated region body
PF: predicated region fallthrough
CT: control target
= control target key end

     0   :  { %7 = vsyncpa [#allocation3], 0  ;;  %s152_s0 = inlined_call_operand.hbm [shape: f32[2,128], index: 0, kind: input, shape index: {}]   ;;  %s153_s1 = inlined_call_operand.vmem [shape: f32[2,128], index: 1, kind: input, shape index: {}]   ;;  %s154_s2 = inlined_call_operand.hbm [shape: f32[2,128], index: 2, kind: output, shape index: {}]  }
   0x1   :  { %8 = vsyncpa [#allocation4], 0  ;;  %s105_s9 = smov [#allocation2]   ;;  %s57_s13 = scalar_lea.hbm %s152_s0, 32 }
   0x2   :  { %s15_s10 = sshll.u32 %s105_s9, 4  ;;  %p58_p0 = scmp.ne.s32.totalorder %s152_s0, %s57_s13  ;;  %s16_s10 = int_to_ptr.vmem [resolvable:$true] %s15_s10 }
   0x3   :  { %p61_p1 = scmp.lt.u32.totalorder %s57_s13, %s152_s0 }
   0x5   :  { %p63_p2 = pnand %p61_p1, %p58_p0 }
   0x7   :  { %66 = shalt.err (!%p63_p2)
}
   0x8   :  { %s67_s18 = scalar_lea.vmem %s16_s10, 32  ;;  %p72_p4 = scmp.lt.s32.totalorder %s16_s10, %s16_s10 }
   0x9   :  { %p68_p3 = scmp.ne.s32.totalorder %s16_s10, %s67_s18  ;;  %p73_p5 = scmp.lt.s32.totalorder %s67_s18, %s67_s18 }
   0xb   :  { %p74_p6 = por %p73_p5, %p72_p4 }
   0xd   :  { %p75_p7 = pnand %p74_p6, %p68_p3 }
   0xf   :  { %78 = shalt.err (!%p75_p7)
}
  0x10   :  { %18 = dma.hbm_to_vmem [thread:$0]  %s152_s0, 32, %s16_s10, [#allocation3]  }
  0x11   :  { %101 = dma.done.wait [#allocation3], 32  }
  0x12   :  { %102 = vsyncadd [#allocation3], 4294967264  ;;  %s106_s21 = smov [#allocation5]   ;;  %v53_v0 = vld [vmem:[%s153_s1] ss:$0 sm:$0xff] }
  0x13   :  { %s44_s22 = sshll.u32 %s106_s21, 4  ;;  %v54_v1 = vld [vmem:[%s153_s1 + $0x1] ss:$0 sm:$0xff]  ;;  %s45_s22 = int_to_ptr.vmem [resolvable:$true] %s44_s22 }
  0x14   :  { %v26_v2 = vld [vmem:[#allocation2] sm:$0x3]  ;;  %s79_s27 = scalar_lea.vmem %s45_s22, 32  ;;  %p84_p9 = scmp.lt.s32.totalorder %s45_s22, %s45_s22 }
  0x15   :  { %v31_v3 = vmul.f32 %v53_v0, %v26_v2  ;;  %p80_p8 = scmp.ne.s32.totalorder %s45_s22, %s79_s27  ;;  %p85_p10 = scmp.lt.s32.totalorder %s79_s27, %s79_s27 }
  0x17   :  { %v36_v4 = vadd.f32 %v54_v1, %v31_v3  ;;  %p86_p11 = por %p85_p10, %p84_p9 }
  0x19   :  { %37 = vst [vmem:[#allocation5] sm:$0x3] %v36_v4  ;;  %p87_p12 = pnand %p86_p11, %p80_p8 }
  0x1b   :  { %90 = shalt.err (!%p87_p12)
}
  0x1c   :  { %s91_s29 = scalar_lea.hbm %s154_s2, 32 }
  0x1d   :  { %p92_p13 = scmp.ne.s32.totalorder %s154_s2, %s91_s29  ;;  %p95_p0 = scmp.lt.u32.totalorder %s91_s29, %s154_s2 }
  0x1f   :  { %p97_p1 = pnand %p95_p0, %p92_p13 }
  0x21   :  { %100 = shalt.err (!%p97_p1)
}
  0x22   :  { %47 = dma.vmem_to_hbm [thread:$0]  %s45_s22, 32, %s154_s2, [#allocation4]  }
  0x23   :  { %103 = dma.done.wait [#allocation4], 32  }
  0x24   :  { %104 = vsyncadd [#allocation4], 4294967264 }
  0x25   :  { %51 = vsyncpa [#allocation3], 1 }
  0x26   :  { %52 = vsyncpa [#allocation4], 1 }

</bundles_post_ra>
